<compile_context>
chip_gen: v7x
topology: tpu7x:2x2x1
jax: 0.10.0
libtpu: 0.0.40
codegen_flags: <defaults>
</compile_context>

<pallas_src>
import functools

import jax
import jax.numpy as jnp
from jax.experimental import pallas as pl
from jax.experimental.pallas import tpu as pltpu


def _renderer_kernel(verts_ref, deform_ref, weight_ref,
                     vdef_ref, wreg_ref,
                     *, deform_scale, inv_total_weight_elems):
    # Elementwise deform + add: EUP tanh, VPU mul/add, whole slab in one shot.
    vdef_ref[...] = (verts_ref[...]
                     + jnp.tanh(deform_ref[...]) * deform_scale
                     ).astype(vdef_ref.dtype)

    # mean(weight**2) over the fully (8,128)-tiled weight slab → SMEM scalar.
    w = weight_ref[...]
    wreg_ref[0, 0] = jnp.sum(w * w) * inv_total_weight_elems


def _dense_2d(total):
    """Pick a (rows, cols) row-major reshape of a flat buffer that maximizes
    (8,128) vreg fill: prefer cols % 128 == 0 with the most sublanes, else the
    largest row count <= 8 that divides the element count."""
    for r in range(8, 0, -1):
        if total % r == 0 and (total // r) % 128 == 0:
            return r, total // r
    for r in range(8, 0, -1):
        if total % r == 0:
            return r, total // r
    return 1, total


def renderer_forward(verts, deform, weight, sdf, *, tet_grid_size, scale):
    """Pallas analogue of Renderer.forward.

    Returns (results, v_deformed). `results` holds 'flex_weight_loss'.
    Mesh extraction (verts/faces lists, flex_surf_loss) is not reproduced
    (see TODO above); `sdf` is accepted for signature parity.
    """
    del sdf  # only consumed by the untranslated mesh-extraction path

    B, N, C = verts.shape
    assert deform.shape == (B, N, C)
    Bw, M, W = weight.shape
    assert Bw == B

    # Lane-/sublane-dense layout plumbing (free row-major reshapes in XLA).
    vr, vc = _dense_2d(B * N * C)     # e.g. (6, 729)   for B=2, N=729, C=3
    wr, wc = _dense_2d(B * M * W)     # e.g. (8, 2688)  for B=2, M=512, W=21
    verts_f = verts.reshape(vr, vc)
    deform_f = deform.reshape(vr, vc)
    weight_f = weight.reshape(wr, wc)

    deform_scale = (1.0 / tet_grid_size) * scale / 0.95 * 0.5
    inv_total = 1.0 / float(B * M * W)

    kernel = functools.partial(
        _renderer_kernel,
        deform_scale=float(deform_scale),          # plain Python floats: inlined
        inv_total_weight_elems=float(inv_total),   # as trace-time constants.
    )

    v_deformed_f, wreg = pl.pallas_call(
        kernel,
        out_shape=(
            jax.ShapeDtypeStruct((vr, vc), verts.dtype),
            jax.ShapeDtypeStruct((1, 1), jnp.float32),
        ),
        # Gridless single-shot kernel: whole arrays resident in VMEM.
        in_specs=[
            pl.BlockSpec(memory_space=pltpu.MemorySpace.VMEM),   # verts
            pl.BlockSpec(memory_space=pltpu.MemorySpace.VMEM),   # deform
            pl.BlockSpec(memory_space=pltpu.MemorySpace.VMEM),   # weight
        ],
        out_specs=(
            pl.BlockSpec(memory_space=pltpu.MemorySpace.VMEM),   # v_deformed
            pl.BlockSpec(memory_space=pltpu.MemorySpace.SMEM),   # scalar loss
        ),
    )(verts_f, deform_f, weight_f)

    results = {"flex_weight_loss": wreg[0, 0]}
    return results, v_deformed_f.reshape(B, N, C)


if __name__ == "__main__":
    key = jax.random.PRNGKey(0)
    k1, k2, k3, k4 = jax.random.split(key, 4)

    tet_grid_size = 8
    scale = 2.0

    B = 2                                # n_shape
    N_verts = (tet_grid_size + 1) ** 3   # 729 grid vertices
    N_cubes = tet_grid_size ** 3         # 512 cubes
    W = 21                               # flexicubes weights per cube

    verts = jax.random.uniform(k1, (B, N_verts, 3), jnp.float32, -1.0, 1.0)
    deform = jax.random.normal(k2, (B, N_verts, 3), jnp.float32)
    weight = jax.random.normal(k3, (B, N_cubes, W), jnp.float32) * 0.1
    sdf = jax.random.normal(k4, (B, N_verts, 1), jnp.float32)

    results, v_deformed = renderer_forward(
        verts, deform, weight, sdf, tet_grid_size=tet_grid_size, scale=scale
    )
    jax.block_until_ready((results, v_deformed))

    # Pure-JAX reference check of the translated portion.
    d_ref = jnp.tanh(deform) / tet_grid_size * scale / 0.95 * 0.5
    v_ref = verts + d_ref
    wreg_ref = jnp.mean(weight ** 2)
    assert jnp.allclose(v_deformed, v_ref, atol=1e-5, rtol=1e-5)
    assert jnp.allclose(results["flex_weight_loss"], wreg_ref, atol=1e-6, rtol=1e-5)

    print("KERNEL_OK")
</pallas_src>

<mosaic_0001>
module attributes {stable_mosaic.version = 11 : i64} {
  func.func @_renderer_kernel(%arg0: memref<6x729xf32, #tpu.memory_space<vmem>>, %arg1: memref<6x729xf32, #tpu.memory_space<vmem>>, %arg2: memref<8x2688xf32, #tpu.memory_space<vmem>>, %arg3: memref<6x729xf32, #tpu.memory_space<vmem>>, %arg4: memref<1x1xf32, #tpu.memory_space<smem>>) attributes {dimension_semantics = [], scalar_prefetch = 0 : i64, scratch_operands = 0 : i64, tpu.core_type = #tpu.core_type<tc>} {
    %c0 = arith.constant 0 : index
    %c0_0 = arith.constant 0 : index
    %0 = vector.load %arg0[%c0, %c0_0] : memref<6x729xf32, #tpu.memory_space<vmem>>, vector<6x729xf32>
    %c0_1 = arith.constant 0 : index
    %c0_2 = arith.constant 0 : index
    %1 = vector.load %arg1[%c0_1, %c0_2] : memref<6x729xf32, #tpu.memory_space<vmem>>, vector<6x729xf32>
    %2 = math.tanh %1 : vector<6x729xf32>
    %cst = arith.constant 0.131578952 : f32
    %3 = vector.broadcast %cst : f32 to vector<6x729xf32>
    %4 = arith.mulf %2, %3 : vector<6x729xf32>
    %5 = arith.addf %0, %4 : vector<6x729xf32>
    %c0_3 = arith.constant 0 : index
    %c0_4 = arith.constant 0 : index
    %6 = vector.load %arg3[%c0_3, %c0_4] : memref<6x729xf32, #tpu.memory_space<vmem>>, vector<6x729xf32>
    tpu.vector_store %arg3[%c0_3, %c0_4], %5 {strides = array<i32>} : memref<6x729xf32, #tpu.memory_space<vmem>>, vector<6x729xf32>,
    %c0_5 = arith.constant 0 : index
    %c0_6 = arith.constant 0 : index
    %7 = vector.load %arg2[%c0_5, %c0_6] : memref<8x2688xf32, #tpu.memory_space<vmem>>, vector<8x2688xf32>
    %8 = arith.mulf %7, %7 : vector<8x2688xf32>
    %9 = vector.shape_cast %8 : vector<8x2688xf32> to vector<1x8x2688xf32>
    %cst_7 = arith.constant dense<0.000000e+00> : vector<1xf32>
    %10 = vector.multi_reduction <add>, %9, %cst_7 [1, 2] : vector<1x8x2688xf32> to vector<1xf32>
    %11 = vector.shape_cast %10 : vector<1xf32> to vector<1x1x1xf32>
    %12 = vector.extract %11[0, 0, 0] : f32 from vector<1x1x1xf32>
    %cst_8 = arith.constant 4.65029771E-5 : f32
    %13 = arith.mulf %12, %cst_8 : f32
    %c0_9 = arith.constant 0 : index
    %c0_10 = arith.constant 0 : index
    %14 = memref.load %arg4[%c0_9, %c0_10] : memref<1x1xf32, #tpu.memory_space<smem>>
    memref.store %13, %arg4[%c0_9, %c0_10] : memref<1x1xf32, #tpu.memory_space<smem>>
    return
  }
}

</mosaic_0001>

<bundles_post_ra>
// kernel: tpu_custom_call.1
= control target key start
LH: loop header
LB: loop body
LE: loop exit
PB: predicated region body
PF: predicated region fallthrough
CT: control target
= control target key end

     0   :  { %10 = vsyncpa [#allocation3], 0  ;;  %s408_s0 = inlined_call_operand.hbm [shape: f32[6,729], index: 0, kind: input, shape index: {}]   ;;  %s409_s1 = inlined_call_operand.hbm [shape: f32[6,729], index: 1, kind: input, shape index: {}]   ;;  %s410_s2 = inlined_call_operand.hbm [shape: f32[8,2688], index: 2, kind: input, shape index: {}]   ;;  %s411_s3 = inlined_call_operand.hbm [shape: f32[6,729], index: 3, kind: output, shape index: {0}]   ;;  %s412_s4 = inlined_call_operand.hbm [shape: f32[1,1], index: 4, kind: output, shape index: {1}]  }
   0x1   :  { %11 = vsyncpa [#allocation7], 0 }
   0x2   :  { %12 = vsyncpa [#allocation4], 0 }
   0x3   :  { %13 = vsyncpa [#allocation5], 0  ;;  %s318_s15 = smov [#allocation6]   ;;  %s319_s17 = smov [#allocation2]  }
   0x4   :  { %s30_s16 = sshll.u32 %s318_s15, 4  ;;  %s20_s18 = sshll.u32 %s319_s17, 4  ;;  %s31_s16 = int_to_ptr.vmem [resolvable:$true] %s30_s16  ;;  %s21_s18 = int_to_ptr.vmem [resolvable:$true] %s20_s18 }
   0x5   :  { %s212_s21 = scalar_lea.hbm %s409_s1, 768 }
   0x6   :  { %p213_p0 = scmp.ne.s32.totalorder %s409_s1, %s212_s21  ;;  %p216_p1 = scmp.lt.u32.totalorder %s212_s21, %s409_s1 }
   0x8   :  { %p218_p2 = pnand %p216_p1, %p213_p0 }
   0xa   :  { %221 = shalt.err (!%p218_p2)
}
   0xb   :  { %s222_s26 = scalar_lea.vmem %s31_s16, 768  ;;  %p227_p4 = scmp.lt.s32.totalorder %s31_s16, %s31_s16 }
   0xc   :  { %p223_p3 = scmp.ne.s32.totalorder %s31_s16, %s222_s26  ;;  %p228_p5 = scmp.lt.s32.totalorder %s222_s26, %s222_s26 }
   0xe   :  { %p229_p6 = por %p228_p5, %p227_p4 }
  0x10   :  { %p230_p7 = pnand %p229_p6, %p223_p3 }
  0x12   :  { %233 = shalt.err (!%p230_p7)
}
  0x13   :  { %33 = dma.hbm_to_vmem [thread:$0]  %s409_s1, 768, %s31_s16, [#allocation7]  }
  0x14   :  { %s234_s5 = scalar_lea.hbm %s408_s0, 768 }
  0x15   :  { %p235_p8 = scmp.ne.s32.totalorder %s408_s0, %s234_s5  ;;  %p238_p9 = scmp.lt.u32.totalorder %s234_s5, %s408_s0 }
  0x17   :  { %p240_p10 = pnand %p238_p9, %p235_p8 }
  0x19   :  { %243 = shalt.err (!%p240_p10)
}
  0x1a   :  { %s244_s10 = scalar_lea.vmem %s21_s18, 768  ;;  %p249_p12 = scmp.lt.s32.totalorder %s21_s18, %s21_s18 }
  0x1b   :  { %p245_p11 = scmp.ne.s32.totalorder %s21_s18, %s244_s10  ;;  %p250_p13 = scmp.lt.s32.totalorder %s244_s10, %s244_s10 }
  0x1d   :  { %p251_p0 = por %p250_p13, %p249_p12 }
  0x1f   :  { %p252_p1 = pnand %p251_p0, %p245_p11 }
  0x21   :  { %255 = shalt.err (!%p252_p1)
}
  0x22   :  { %23 = dma.hbm_to_vmem [thread:$0]  %s408_s0, 768, %s21_s18, [#allocation3]  }
  0x23   :  { %s320_s12 = smov [#allocation8]   ;;  %s256_s16 = scalar_lea.hbm %s410_s2, 2688 }
  0x24   :  { %s40_s13 = sshll.u32 %s320_s12, 4  ;;  %p257_p2 = scmp.ne.s32.totalorder %s410_s2, %s256_s16  ;;  %s41_s13 = int_to_ptr.vmem [resolvable:$true] %s40_s13 }
  0x25   :  { %p260_p3 = scmp.lt.u32.totalorder %s256_s16, %s410_s2 }
  0x27   :  { %p262_p4 = pnand %p260_p3, %p257_p2 }
  0x29   :  { %265 = shalt.err (!%p262_p4)
}
  0x2a   :  { %s266_s22 = scalar_lea.vmem %s41_s13, 2688  ;;  %p271_p6 = scmp.lt.s32.totalorder %s41_s13, %s41_s13 }
  0x2b   :  { %p267_p5 = scmp.ne.s32.totalorder %s41_s13, %s266_s22  ;;  %p272_p7 = scmp.lt.s32.totalorder %s266_s22, %s266_s22 }
  0x2d   :  { %p273_p8 = por %p272_p7, %p271_p6 }
  0x2f   :  { %p274_p9 = pnand %p273_p8, %p267_p5 }
  0x31   :  { %277 = shalt.err (!%p274_p9)
}
  0x32   :  { %43 = dma.hbm_to_vmem [thread:$0]  %s410_s2, 2688, %s41_s13, [#allocation7]  }
  0x33   :  { %310 = dma.done.wait [#allocation3], 768  }
  0x34   :  { %311 = vsyncadd [#allocation3], 4294966528 }
  0x35   :  { %312 = dma.done.wait [#allocation7], 3456  }
  0x36   :  { %313 = vsyncadd [#allocation7], 4294963840  ;;  %v90_v0 = vld [vmem:[#allocation8] sm:$0xff]  ;;  %v91_v1 = vld [vmem:[#allocation8 + $0x8] sm:$0xff]  ;;  %s321_s2 = smov [#allocation9]   ;;  %vm88_vm0 = vcmask 726016  }
  0x37   :  { %v92_v2 = vld [vmem:[#allocation8 + $0x10] sm:$0xff]  ;;  %v93_v3 = vld [vmem:[#allocation8 + $0x18] sm:$0xff]  ;;  %v111_v4 = vmul.f32 %v90_v0, %v90_v0  ;;  %v112_v5 = vmul.f32 %v91_v1, %v91_v1  ;;  %v94_v7 = vld [vmem:[#allocation8 + $0x20] sm:$0xff]  ;;  %s170_s23 = sshll.u32 %s321_s2, 4  ;;  %s171_s23 = int_to_ptr.vmem [resolvable:$true] %s170_s23 }
  0x38   :  { %v113_v6 = vmul.f32 %v92_v2, %v92_v2  ;;  %v114_v8 = vmul.f32 %v93_v3, %v93_v3  ;;  %v95_v10 = vld [vmem:[#allocation8 + $0x28] sm:$0xff]  ;;  %v115_v11 = vmul.f32 %v94_v7, %v94_v7  ;;  %v96_v13 = vld [vmem:[#allocation8 + $0x30] sm:$0xff]  ;;  %v97_v16 = vld [vmem:[#allocation8 + $0x38] sm:$0xff]  ;;  %s278_s24 = scalar_lea.vmem %s171_s23, 768  ;;  %p283_p11 = scmp.lt.s32.totalorder %s171_s23, %s171_s23 }
  0x39   :  { %v132_v9 = vadd.f32 %v112_v5, %v111_v4  ;;  %v116_v14 = vmul.f32 %v95_v10, %v95_v10  ;;  %v117_v17 = vmul.f32 %v96_v13, %v96_v13  ;;  %v98_v19 = vld [vmem:[#allocation8 + $0x40] sm:$0xff]  ;;  %v118_v20 = vmul.f32 %v97_v16, %v97_v16  ;;  %v99_v22 = vld [vmem:[#allocation8 + $0x48] sm:$0xff]  ;;  %v100_v25 = vld [vmem:[#allocation8 + $0x50] sm:$0xff]  ;;  %p279_p10 = scmp.ne.s32.totalorder %s171_s23, %s278_s24  ;;  %p284_p12 = scmp.lt.s32.totalorder %s278_s24, %s278_s24 }
  0x3a   :  { %v119_v23 = vmul.f32 %v98_v19, %v98_v19  ;;  %v120_v26 = vmul.f32 %v99_v22, %v99_v22  ;;  %v101_v28 = vld [vmem:[#allocation8 + $0x58] sm:$0xff]  ;;  %v121_v29 = vmul.f32 %v100_v25, %v100_v25  ;;  %v102_v31 = vld [vmem:[#allocation8 + $0x60] sm:$0xff]  ;;  %v103_v34 = vld [vmem:[#allocation8 + $0x68] sm:$0xff] }
  0x3b   :  { %v133_v12 = vadd.f32 %v132_v9, %v113_v6  ;;  %v122_v32 = vmul.f32 %v101_v28, %v101_v28  ;;  %v123_v35 = vmul.f32 %v102_v31, %v102_v31  ;;  %v104_v37 = vld [vmem:[#allocation8 + $0x70] sm:$0xff]  ;;  %v124_v38 = vmul.f32 %v103_v34, %v103_v34  ;;  %v105_v40 = vld [vmem:[#allocation8 + $0x78] sm:$0xff]  ;;  %v106_v43 = vld [vmem:[#allocation8 + $0x80] sm:$0xff]  ;;  %p285_p13 = por %p284_p12, %p283_p11 }
  0x3c   :  { %v125_v41 = vmul.f32 %v104_v37, %v104_v37  ;;  %v126_v44 = vmul.f32 %v105_v40, %v105_v40  ;;  %v107_v46 = vld [vmem:[#allocation8 + $0x88] sm:$0xff]  ;;  %v127_v47 = vmul.f32 %v106_v43, %v106_v43  ;;  %v108_v49 = vld [vmem:[#allocation8 + $0x90] sm:$0xff]  ;;  %v109_v52 = vld [vmem:[#allocation8 + $0x98] sm:$0xff] }
  0x3d   :  { %v134_v15 = vadd.f32 %v133_v12, %v114_v8  ;;  %v128_v50 = vmul.f32 %v107_v46, %v107_v46  ;;  %v129_v53 = vmul.f32 %v108_v49, %v108_v49  ;;  %v110_v55 = vld [vmem:[#allocation8 + $0xa0] sm:$0xff]  ;;  %v130_v56 = vmul.f32 %v109_v52, %v109_v52  ;;  %v59_v62 = vld [vmem:[#allocation6] sm:$0x3f]  ;;  %v60_v63 = vld [vmem:[#allocation6 + $0x8] sm:$0x3f]  ;;  %p286_p0 = pnand %p285_p13, %p279_p10 }
  0x3e   :  { %v131_v58 = vmul.f32 %v110_v55, %v110_v55  ;;  %v61_v0 = vld [vmem:[#allocation6 + $0x10] sm:$0x3f]  ;;  %v62_v1 = vld [vmem:[#allocation6 + $0x18] sm:$0x3f]  ;;  %200 = vtanh.f32 %v59_v62  ;;  %v63_v2 = vld [vmem:[#allocation6 + $0x20] sm:$0x3f] }
  0x3f   :  { %v135_v18 = vadd.f32 %v134_v15, %v115_v11  ;;  %202 = vtanh.f32 %v60_v63  ;;  %v64_v3 = vld [vmem:[#allocation6 + $0x28] sm:$0x3f]  ;;  %v53_v8 = vld [vmem:[#allocation2] sm:$0x3f]  ;;  %v54_v9 = vld [vmem:[#allocation2 + $0x8] sm:$0x3f] }
  0x40   :  { %204 = vtanh.f32 %v61_v0  ;;  %v55_v11 = vld [vmem:[#allocation2 + $0x10] sm:$0x3f]  ;;  %v56_v12 = vld [vmem:[#allocation2 + $0x18] sm:$0x3f]  ;;  %v57_v13 = vld [vmem:[#allocation2 + $0x20] sm:$0x3f] }
  0x41   :  { %v136_v21 = vadd.f32 %v135_v18, %v116_v14  ;;  %206 = vtanh.f32 %v62_v1 }
  0x42   :  { %208 = vtanh.f32 %v63_v2 }
  0x43   :  { %v137_v24 = vadd.f32 %v136_v21, %v117_v17  ;;  %210 = vtanh.f32 %v64_v3 }
  0x45   :  { %v138_v27 = vadd.f32 %v137_v24, %v118_v20  ;;  %v58_v20 = vld [vmem:[#allocation2 + $0x28] sm:$0x3f] }
  0x47   :  { %v139_v30 = vadd.f32 %v138_v27, %v119_v23 }
  0x48   :  { %v201_v4 = vpop.eup %200 }
  0x49   :  { %v140_v33 = vadd.f32 %v139_v30, %v120_v26  ;;  %v203_v5 = vpop.eup %202  ;;  %v71_v6 = vmul.f32 0.13157895, %v201_v4 }
  0x4a   :  { %v205_v7 = vpop.eup %204  ;;  %v72_v16 = vmul.f32 0.13157895, %v203_v5 }
  0x4b   :  { %v141_v36 = vadd.f32 %v140_v33, %v121_v29  ;;  %v207_v10 = vpop.eup %206  ;;  %v77_v14 = vadd.f32 %v71_v6, %v53_v8  ;;  %v73_v17 = vmul.f32 0.13157895, %v205_v7 }
  0x4c   :  { %v209_v15 = vpop.eup %208  ;;  %v74_v18 = vmul.f32 0.13157895, %v207_v10  ;;  %v78_v23 = vadd.f32 %v72_v16, %v54_v9 }
  0x4d   :  { %v142_v39 = vadd.f32 %v141_v36, %v122_v32  ;;  %v211_v19 = vpop.eup %210  ;;  %v75_v21 = vmul.f32 0.13157895, %v209_v15  ;;  %83 = vst [vmem:[#allocation9] sm:$0x3f] %v77_v14  ;;  %v79_v24 = vadd.f32 %v73_v17, %v55_v11 }
  0x4e   :  { %v76_v22 = vmul.f32 0.13157895, %v211_v19  ;;  %v80_v25 = vadd.f32 %v74_v18, %v56_v12  ;;  %84 = vst [vmem:[#allocation9 + $0x8] sm:$0x3f] %v78_v23 }
  0x4f   :  { %v143_v42 = vadd.f32 %v142_v39, %v123_v35  ;;  %v81_v26 = vadd.f32 %v75_v21, %v57_v13  ;;  %85 = vst [vmem:[#allocation9 + $0x10] sm:$0x3f] %v79_v24 }
  0x50   :  { %v82_v27 = vadd.f32 %v76_v22, %v58_v20  ;;  %86 = vst [vmem:[#allocation9 + $0x18] sm:$0x3f] %v80_v25 }
  0x51   :  { %v144_v45 = vadd.f32 %v143_v42, %v124_v38  ;;  %87 = vst [vmem:[#allocation9 + $0x20] sm:$0x3f] %v81_v26 }
  0x52   :  { %89 = vst.msk [vmem:[#allocation9 + $0x28] sm:$0x3f] %vm88_vm0, %v82_v27 }
  0x53   :  { %v145_v48 = vadd.f32 %v144_v45, %v125_v41 }
  0x55   :  { %v146_v51 = vadd.f32 %v145_v48, %v126_v44 }
  0x57   :  { %v147_v54 = vadd.f32 %v146_v51, %v127_v47 }
  0x59   :  { %v148_v57 = vadd.f32 %v147_v54, %v128_v50 }
  0x5b   :  { %v149_v59 = vadd.f32 %v148_v57, %v129_v53 }
  0x5d   :  { %v150_v60 = vadd.f32 %v149_v59, %v130_v56 }
  0x5f   :  { %v151_v61 = vadd.f32 %v150_v60, %v131_v58 }
  0x61   :  { %152 = vadd.xlane.f32.xlu0 %v151_v61 }
  0x62   :  { %289 = shalt.err (!%p286_p0)
}
  0x63   :  { %s290_s27 = scalar_lea.hbm %s411_s3, 768 }
  0x64   :  { %p291_p1 = scmp.ne.s32.totalorder %s411_s3, %s290_s27  ;;  %p294_p2 = scmp.lt.u32.totalorder %s290_s27, %s411_s3 }
  0x66   :  { %p296_p3 = pnand %p294_p2, %p291_p1 }
  0x68   :  { %299 = shalt.err (!%p296_p3)
}
  0x69   :  { %173 = dma.vmem_to_hbm [thread:$0]  %s171_s23, 768, %s411_s3, [#allocation4]  }
  0x6a   :  { %s300_s11 = scalar_lea.hbm %s412_s4, 16 }
  0x6b   :  { %p301_p4 = scmp.ne.s32.totalorder %s412_s4, %s300_s11  ;;  %p304_p5 = scmp.lt.u32.totalorder %s300_s11, %s412_s4 }
  0x6d   :  { %p306_p6 = pnand %p304_p5, %p301_p4 }
  0xee   :  { %v153_v28 = vpop.xlane.xlu0 %152 }
  0xef   :  { %v154_v29 = vrot.slane %v153_v28, 4 }
  0xf1   :  { %v155_v30 = vadd.f32 %v154_v29, %v153_v28 }
  0xf3   :  { %v156_v31 = vrot.slane %v155_v30, 2 }
  0xf5   :  { %v157_v32 = vadd.f32 %v156_v31, %v155_v30 }
  0xf7   :  { %v158_v33 = vrot.slane %v157_v32, 1 }
  0xf9   :  { %v159_v34 = vadd.f32 %v158_v33, %v157_v32 }
  0xfb   :  { %193 = vpush %v159_v34 }
 0x12c   :  { %s194_s8 = spop %193 }
 0x12d   :  { %s161_s9 = smul.f32 4.6502977e-05, %s194_s8 }
 0x12f   :  { %163 = sst [smem:[#allocation10]] %s161_s9 }
 0x130   :  { %309 = shalt.err (!%p306_p6)
}
 0x131   :  { %s322_s15 = smov [#allocation10]  }
 0x132   :  { %181 = dma.smem_to_hbm %s322_s15, 16, %s412_s4, [#allocation5]  }
 0x133   :  { %314 = dma.done.wait [#allocation4], 768  }
 0x134   :  { %315 = vsyncadd [#allocation4], 4294966528 }
 0x135   :  { %316 = dma.done.wait [#allocation5], 16  }
 0x136   :  { %317 = vsyncadd [#allocation5], 4294967280 }
 0x137   :  { %188 = sfence }
 0x138   :  { %189 = vsyncpa [#allocation3], 1 }
 0x139   :  { %190 = vsyncpa [#allocation7], 1 }
 0x13a   :  { %191 = vsyncpa [#allocation4], 1 }
 0x13b   :  { %192 = vsyncpa [#allocation5], 1 }

</bundles_post_ra>
